<compile_context>
chip_gen: v7x
topology: tpu7x:2x2x1
jax: 0.10.0
libtpu: 0.0.40
codegen_flags: <defaults>
</compile_context>

<pallas_src>
import jax
import jax.numpy as jnp
import numpy as np
from jax.experimental import pallas as pl
from jax.experimental.pallas import tpu as pltpu


def _round_up(x, m):
    return ((x + m - 1) // m) * m


# -----------------------------------------------------------------------------
# Pallas kernel: T fused decoder steps, grid = (T, num_vocab_tiles)
# -----------------------------------------------------------------------------
def _decoder_kernel(
    tok_ref,        # SMEM scalar prefetch: (T,) int32 token schedule (used by index_maps)
    emb_ref,        # (1, 1, Hp) bf16 : embedding row of step-t's token (gathered via index_map)
    h0_ref,         # (1, Hp)   f32  : initial hidden state (zero-padded)
    w_ih_t_ref,     # (Hp, 3Hp) bf16 : GRU input weights, transposed, gate blocks r|z|n
    w_hh_t_ref,     # (Hp, 3Hp) bf16 : GRU hidden weights, transposed
    b_ih_ref,       # (1, 3Hp)  f32
    b_hh_ref,       # (1, 3Hp)  f32
    w_out_t_ref,    # (Hk, TILE_V) bf16 : current vocab tile of the output Linear
    b_out_ref,      # (1, TILE_V)  f32  : padded vocab entries hold -1e30
    logp_ref,       # out: (1, num_tiles, 1, TILE_V) f32 (resident across the vocab axis)
    h_out_ref,      # out: (1, Hp) f32 final hidden state (resident block)
    m_sc,           # scratch: (1, 1) f32 running max
    l_sc,           # scratch: (1, 1) f32 running sum-of-exp
    h_sc,           # scratch: (1, Hp) f32 hidden state carried across all grid steps
):
    t = pl.program_id(0)
    j = pl.program_id(1)
    n_steps = pl.num_programs(0)
    n_tiles = pl.num_programs(1)
    Hp = h0_ref.shape[1]
    Hk = w_out_t_ref.shape[0]

    # ---- load the initial hidden state once
    @pl.when(jnp.logical_and(t == 0, j == 0))
    def _init_h():
        h_sc[...] = h0_ref[...]

    # ---- GRU cell (PyTorch r,z,n semantics): once per decode step, on tile 0
    @pl.when(j == 0)
    def _gru():
        x = jnp.maximum(emb_ref[0], 0.0)                       # relu(embedding), (1, Hp) bf16
        h = h_sc[...]                                          # (1, Hp) f32
        gi = jnp.dot(x, w_ih_t_ref[...],
                     preferred_element_type=jnp.float32) + b_ih_ref[...]
        gh = jnp.dot(h.astype(jnp.bfloat16), w_hh_t_ref[...],
                     preferred_element_type=jnp.float32) + b_hh_ref[...]
        r = jax.nn.sigmoid(gi[:, 0 * Hp:1 * Hp] + gh[:, 0 * Hp:1 * Hp])
        z = jax.nn.sigmoid(gi[:, 1 * Hp:2 * Hp] + gh[:, 1 * Hp:2 * Hp])
        n = jnp.tanh(gi[:, 2 * Hp:3 * Hp] + r * gh[:, 2 * Hp:3 * Hp])
        h_sc[...] = (1.0 - z) * n + z * h                      # (1, Hp) f32
        # reset online-softmax state for this step (finite sentinel, see header)
        m_sc[...] = jnp.full(m_sc.shape, -1e30, m_sc.dtype)
        l_sc[...] = jnp.zeros(l_sc.shape, l_sc.dtype)

    # ---- output Linear for this vocab tile, written straight into the output block
    h_bf = h_sc[:, :Hk].astype(jnp.bfloat16)                   # (1, Hk): K padded only to 16
    logits = jnp.dot(h_bf, w_out_t_ref[...],
                     preferred_element_type=jnp.float32) + b_out_ref[...]
    logp_ref[0, j] = logits                                    # raw logits for now

    # ---- online logsumexp update (hides under the next tile's DMA)
    m_prev = m_sc[...]
    m_new = jnp.maximum(m_prev, jnp.max(logits))
    l_sc[...] = l_sc[...] * jnp.exp(m_prev - m_new) + jnp.sum(jnp.exp(logits - m_new))
    m_sc[...] = m_new

    # ---- finalize step t: LogSoftmax in place over the whole (padded) vocab
    @pl.when(j == n_tiles - 1)
    def _finalize():
        lse = m_sc[...] + jnp.log(l_sc[...])                   # (1, 1)
        logp_ref[...] = logp_ref[...] - lse                    # one lane-dense pass

    # ---- emit the final hidden state once, at the very last grid point
    @pl.when(jnp.logical_and(t == n_steps - 1, j == n_tiles - 1))
    def _store_h():
        h_out_ref[...] = h_sc[...]


# -----------------------------------------------------------------------------
# One-time parameter preparation (transpose / pad / bf16 cast) -- amortized
# over all decode calls.
# -----------------------------------------------------------------------------
def prepare_decoder_params(params, *, tile_v=8192, resident_budget_bytes=40 << 20):
    f32, bf16 = jnp.float32, jnp.bfloat16

    emb = params["embedding"].astype(f32)      # (V, H)
    w_ih = params["w_ih"].astype(f32)          # (3H, H), gate order r,z,n
    w_hh = params["w_hh"].astype(f32)          # (3H, H)
    b_ih = params["b_ih"].astype(f32)          # (3H,)
    b_hh = params["b_hh"].astype(f32)          # (3H,)
    w_out = params["w_out"].astype(f32)        # (V, H)
    b_out = params["b_out"].astype(f32)        # (V,)

    V, H = emb.shape
    Hp = _round_up(H, 128)                     # lane-aligned GRU gate blocks / hidden state
    Hk = _round_up(H, 16)                      # bf16 sublane multiple: output-GEMV contraction dim
    Vp128 = _round_up(V, 128)

    # Vocab tiling: request large tiles; keep the whole projection resident when it fits.
    tile_v = min(_round_up(tile_v, 128), Vp128)
    full_w_out_bytes = 2 * (Hk * Vp128 * 2 + 8 * Vp128 * 4)    # double-buffered w_out + b_out
    if full_w_out_bytes <= resident_budget_bytes:
        tile_v = Vp128                                         # single tile -> VMEM-resident
    Vp = _round_up(V, tile_v)
    num_tiles = Vp // tile_v

    def gates_t(w):
        # (3H, H) -> (Hp, 3Hp): per-gate transpose + zero-pad, gate blocks lane-aligned.
        cols = []
        for g in range(3):
            wg = jnp.pad(w[g * H:(g + 1) * H, :].T, ((0, Hp - H), (0, Hp - H)))
            cols.append(wg)
        return jnp.concatenate(cols, axis=1)

    def gate_bias(b):
        parts = [jnp.pad(b[g * H:(g + 1) * H], (0, Hp - H)) for g in range(3)]
        return jnp.concatenate(parts).reshape(1, 3 * Hp)

    # Rough double-buffered VMEM footprint (sublane-padded where relevant).
    est = (
        2 * Hk * tile_v * 2                # streamed/resident w_out tile
        + 2 * 8 * tile_v * 4               # b_out tile
        + 2 * num_tiles * 8 * tile_v * 4   # resident logp output block
        + 2 * 2 * Hp * 3 * Hp * 2          # w_ih_t + w_hh_t
        + 2 * 2 * 8 * 3 * Hp * 4           # biases
        + 2 * 8 * Hp * 2                   # embedding row block
        + 6 * 8 * Hp * 4                   # h0 / h_out blocks + hidden scratch
        + (1 << 20)                        # misc / semaphores / slack
    )
    vmem_limit_bytes = int(min(96 << 20, max(2 * est, 16 << 20)))

    return {
        # (V, 1, Hp) so only the token's row is DMA'd by the gather index_map.
        "emb": jnp.pad(emb, ((0, 0), (0, Hp - H))).astype(bf16).reshape(V, 1, Hp),
        "w_ih_t": gates_t(w_ih).astype(bf16),                      # (Hp, 3Hp)
        "w_hh_t": gates_t(w_hh).astype(bf16),                      # (Hp, 3Hp)
        "b_ih": gate_bias(b_ih),                                   # (1, 3Hp) f32
        "b_hh": gate_bias(b_hh),                                   # (1, 3Hp) f32
        # K dim padded only to Hk (not 128): big HBM/VMEM saving when H is small.
        "w_out_t": jnp.pad(w_out.T, ((0, Hk - H), (0, Vp - V))).astype(bf16),  # (Hk, Vp)
        # padded vocab columns get a finite -1e30 so they drop out of the logsumexp
        "b_out": jnp.pad(b_out.reshape(1, V), ((0, 0), (0, Vp - V)),
                         constant_values=-1e30),                   # (1, Vp) f32
        "H": H, "V": V, "Hp": Hp, "Hk": Hk, "Vp": Vp,
        "tile_v": tile_v, "num_tiles": num_tiles,
        "vmem_limit_bytes": vmem_limit_bytes,
    }


# -----------------------------------------------------------------------------
# Wrapper: T fused decode steps (teacher-forced token schedule) in one call.
# -----------------------------------------------------------------------------
def decoder_forward(token_ids, hidden, prep):
    """token_ids: (T,) int, hidden: (1,1,H) f32 -> (log_probs (T,V), hidden (1,1,H))."""
    H, V = prep["H"], prep["V"]
    Hp, Hk, Vp = prep["Hp"], prep["Hk"], prep["Vp"]
    tile_v, num_tiles = prep["tile_v"], prep["num_tiles"]
    T = int(token_ids.shape[0])

    tok = jnp.reshape(token_ids, (T,)).astype(jnp.int32)
    h0 = jnp.pad(hidden.reshape(1, H).astype(jnp.float32), ((0, 0), (0, Hp - H)))

    grid_spec = pltpu.PrefetchScalarGridSpec(
        num_scalar_prefetch=1,
        grid=(T, num_tiles),
        in_specs=[
            # only the current token's embedding row -- gathered via the prefetched schedule
            pl.BlockSpec((1, 1, Hp), lambda t, j, tok: (tok[t], 0, 0)),
            # grid-invariant (VMEM-resident) small operands
            pl.BlockSpec((1, Hp), lambda t, j, tok: (0, 0)),
            pl.BlockSpec((Hp, 3 * Hp), lambda t, j, tok: (0, 0)),
            pl.BlockSpec((Hp, 3 * Hp), lambda t, j, tok: (0, 0)),
            pl.BlockSpec((1, 3 * Hp), lambda t, j, tok: (0, 0)),
            pl.BlockSpec((1, 3 * Hp), lambda t, j, tok: (0, 0)),
            # output projection: resident if num_tiles == 1, otherwise streamed & pipelined
            pl.BlockSpec((Hk, tile_v), lambda t, j, tok: (0, j)),
            pl.BlockSpec((1, tile_v), lambda t, j, tok: (0, j)),
        ],
        out_specs=[
            # logits/log-probs block is resident across the vocab axis of each step
            pl.BlockSpec((1, num_tiles, 1, tile_v), lambda t, j, tok: (t, 0, 0, 0)),
            pl.BlockSpec((1, Hp), lambda t, j, tok: (0, 0)),
        ],
        scratch_shapes=[
            pltpu.VMEM((1, 1), jnp.float32),    # running max
            pltpu.VMEM((1, 1), jnp.float32),    # running sum-of-exp
            pltpu.VMEM((1, Hp), jnp.float32),   # hidden state carried across steps
        ],
    )

    logp_tiles, h_out = pl.pallas_call(
        _decoder_kernel,
        out_shape=(
            jax.ShapeDtypeStruct((T, num_tiles, 1, tile_v), jnp.float32),
            jax.ShapeDtypeStruct((1, Hp), jnp.float32),
        ),
        grid_spec=grid_spec,
        compiler_params=pltpu.CompilerParams(
            # both axes carry state (hidden across t, logits/softmax stats across j)
            dimension_semantics=("arbitrary", "arbitrary"),
            vmem_limit_bytes=prep["vmem_limit_bytes"],
        ),
    )(tok, prep["emb"], h0, prep["w_ih_t"], prep["w_hh_t"],
      prep["b_ih"], prep["b_hh"], prep["w_out_t"], prep["b_out"])

    logp = logp_tiles.reshape(T, Vp)[:, :V]
    h_new = h_out[:, :H].reshape(1, 1, H)
    return logp, h_new


def decoder_step(token_id, hidden, prep):
    """Single-step API matching the PyTorch module forward: (input, hidden)."""
    logp, h_new = decoder_forward(jnp.reshape(token_id, (1,)).astype(jnp.int32), hidden, prep)
    return logp, h_new


# -----------------------------------------------------------------------------
# Pure-JAX reference (mirrors the PyTorch forward, applied T times; `self.out`
# read as the defined `self.output` Linear).  emulate_bf16=True reproduces the
# kernel's bf16 weight handling for an apples-to-apples numeric check.
# -----------------------------------------------------------------------------
def decoder_forward_ref(token_ids, hidden, params, *, emulate_bf16=False):
    f32 = jnp.float32
    cast = (lambda a: a.astype(jnp.bfloat16)) if emulate_bf16 else (lambda a: a.astype(f32))
    H = params["embedding"].shape[1]

    h = hidden.reshape(1, H).astype(f32)
    logps = []
    for tok in np.asarray(token_ids).reshape(-1):
        x = jnp.maximum(cast(params["embedding"])[int(tok)], 0.0).reshape(1, H)
        gi = jnp.dot(cast(x), cast(params["w_ih"]).T,
                     preferred_element_type=f32) + params["b_ih"]
        gh = jnp.dot(cast(h), cast(params["w_hh"]).T,
                     preferred_element_type=f32) + params["b_hh"]
        r = jax.nn.sigmoid(gi[:, :H] + gh[:, :H])
        z = jax.nn.sigmoid(gi[:, H:2 * H] + gh[:, H:2 * H])
        n = jnp.tanh(gi[:, 2 * H:] + r * gh[:, 2 * H:])
        h = (1.0 - z) * n + z * h
        logits = jnp.dot(cast(h), cast(params["w_out"]).T,
                         preferred_element_type=f32) + params["b_out"]
        logps.append(jax.nn.log_softmax(logits, axis=1))
    return jnp.concatenate(logps, axis=0), h.reshape(1, 1, H)


# -----------------------------------------------------------------------------
def make_params(key, hidden_size, output_size):
    ks = jax.random.split(key, 7)
    s = 1.0 / np.sqrt(hidden_size)
    return {
        "embedding": jax.random.normal(ks[0], (output_size, hidden_size), jnp.float32),
        "w_ih": jax.random.uniform(ks[1], (3 * hidden_size, hidden_size), jnp.float32, -s, s),
        "w_hh": jax.random.uniform(ks[2], (3 * hidden_size, hidden_size), jnp.float32, -s, s),
        "b_ih": jax.random.uniform(ks[3], (3 * hidden_size,), jnp.float32, -s, s),
        "b_hh": jax.random.uniform(ks[4], (3 * hidden_size,), jnp.float32, -s, s),
        "w_out": jax.random.uniform(ks[5], (output_size, hidden_size), jnp.float32, -s, s),
        "b_out": jax.random.uniform(ks[6], (output_size,), jnp.float32, -s, s),
    }


if __name__ == "__main__":
    hidden_size = 32
    output_size = 64
    T = 8                                    # fused decode steps

    key = jax.random.PRNGKey(0)
    kp, kh, kt = jax.random.split(key, 3)
    params = make_params(kp, hidden_size, output_size)

    token_ids = jax.random.randint(kt, (T,), 0, output_size, dtype=jnp.int32)
    hidden = jax.random.normal(kh, (1, 1, hidden_size), jnp.float32)

    prep = prepare_decoder_params(params, tile_v=8192)
    logp, h_new = decoder_forward(token_ids, hidden, prep)
    logp = jax.block_until_ready(logp)
    h_new = jax.block_until_ready(h_new)

    # 1) f32 PyTorch semantics (loose tol: the kernel keeps weights in bf16)
    logp_f32, h_f32 = decoder_forward_ref(token_ids, hidden, params)
    np.testing.assert_allclose(np.asarray(logp), np.asarray(logp_f32), rtol=2e-1, atol=2e-1)
    np.testing.assert_allclose(np.asarray(h_new), np.asarray(h_f32), rtol=2e-1, atol=2e-1)

    # 2) apples-to-apples: same forward with the bf16-rounded operands the kernel uses
    logp_q, h_q = decoder_forward_ref(token_ids, hidden, params, emulate_bf16=True)
    np.testing.assert_allclose(np.asarray(logp), np.asarray(logp_q), rtol=5e-3, atol=5e-3)
    np.testing.assert_allclose(np.asarray(h_new), np.asarray(h_q), rtol=5e-3, atol=5e-3)

    # 3) single-step API (module-style signature) agrees with step 0 of the fused run
    logp1, h1 = decoder_step(token_ids[0], hidden, prep)
    logp1 = jax.block_until_ready(logp1)
    np.testing.assert_allclose(np.asarray(logp1[0]), np.asarray(logp[0]), rtol=1e-5, atol=1e-5)

    print("KERNEL_OK")
</pallas_src>

<mosaic_0001>
module attributes {stable_mosaic.version = 11 : i64} {
  func.func @_decoder_kernel(%arg0: i32, %arg1: i32, %arg2: memref<8xi32, #tpu.memory_space<smem>>, %arg3: memref<1x1x128xbf16, #tpu.memory_space<vmem>>, %arg4: memref<1x128xf32, #tpu.memory_space<vmem>>, %arg5: memref<128x384xbf16, #tpu.memory_space<vmem>>, %arg6: memref<128x384xbf16, #tpu.memory_space<vmem>>, %arg7: memref<1x384xf32, #tpu.memory_space<vmem>>, %arg8: memref<1x384xf32, #tpu.memory_space<vmem>>, %arg9: memref<32x128xbf16, #tpu.memory_space<vmem>>, %arg10: memref<1x128xf32, #tpu.memory_space<vmem>>, %arg11: memref<1x1x1x128xf32, #tpu.memory_space<vmem>>, %arg12: memref<1x128xf32, #tpu.memory_space<vmem>>, %arg13: memref<1x1xf32, #tpu.memory_space<vmem>>, %arg14: memref<1x1xf32, #tpu.memory_space<vmem>>, %arg15: memref<1x128xf32, #tpu.memory_space<vmem>>) attributes {dimension_semantics = [#tpu.dimension_semantics<arbitrary>, #tpu.dimension_semantics<arbitrary>], iteration_bounds = array<i64: 8, 1>, scalar_prefetch = 1 : i64, scratch_operands = 3 : i64, tpu.core_type = #tpu.core_type<tc>, window_params = [{transform_indices = @transform_0, window_bounds = array<i64: 1, 1, 128>}, {pipeline_mode = #tpu.pipeline_mode<synchronous>, transform_indices = @transform_1, window_bounds = array<i64: 1, 128>}, {pipeline_mode = #tpu.pipeline_mode<synchronous>, transform_indices = @transform_2, window_bounds = array<i64: 128, 384>}, {pipeline_mode = #tpu.pipeline_mode<synchronous>, transform_indices = @transform_3, window_bounds = array<i64: 128, 384>}, {pipeline_mode = #tpu.pipeline_mode<synchronous>, transform_indices = @transform_4, window_bounds = array<i64: 1, 384>}, {pipeline_mode = #tpu.pipeline_mode<synchronous>, transform_indices = @transform_5, window_bounds = array<i64: 1, 384>}, {transform_indices = @transform_6, window_bounds = array<i64: 32, 128>}, {transform_indices = @transform_7, window_bounds = array<i64: 1, 128>}, {transform_indices = @transform_8, window_bounds = array<i64: 1, 1, 1, 128>}, {pipeline_mode = #tpu.pipeline_mode<synchronous>, transform_indices = @transform_9, window_bounds = array<i64: 1, 128>}]} {
    %c0_i32 = arith.constant 0 : i32
    %0 = arith.cmpi eq, %arg0, %c0_i32 : i32
    %c0_i32_0 = arith.constant 0 : i32
    %1 = arith.cmpi eq, %arg1, %c0_i32_0 : i32
    %2 = arith.andi %0, %1 : i1
    %3 = arith.extui %2 : i1 to i32
    %c0_i32_1 = arith.constant 0 : i32
    %4 = arith.cmpi ne, %3, %c0_i32_1 : i32
    scf.if %4 {
      %c0_26 = arith.constant 0 : index
      %c0_27 = arith.constant 0 : index
      %48 = vector.load %arg4[%c0_26, %c0_27] : memref<1x128xf32, #tpu.memory_space<vmem>>, vector<1x128xf32>
      %c0_28 = arith.constant 0 : index
      %c0_29 = arith.constant 0 : index
      %49 = vector.load %arg15[%c0_28, %c0_29] : memref<1x128xf32, #tpu.memory_space<vmem>>, vector<1x128xf32>
      tpu.vector_store %arg15[%c0_28, %c0_29], %48 {strides = array<i32>} : memref<1x128xf32, #tpu.memory_space<vmem>>, vector<1x128xf32>,
    } else {
    }
    %c0_i32_2 = arith.constant 0 : i32
    %5 = arith.cmpi eq, %arg1, %c0_i32_2 : i32
    %6 = arith.extui %5 : i1 to i32
    %c0_i32_3 = arith.constant 0 : i32
    %7 = arith.cmpi ne, %6, %c0_i32_3 : i32
    scf.if %7 {
      %c0_26 = arith.constant 0 : index
      %c0_27 = arith.constant 0 : index
      %c0_28 = arith.constant 0 : index
      %48 = vector.load %arg3[%c0_26, %c0_27, %c0_28] : memref<1x1x128xbf16, #tpu.memory_space<vmem>>, vector<1x1x128xbf16>
      %49 = vector.shape_cast %48 : vector<1x1x128xbf16> to vector<1x128xbf16>
      %cst_29 = arith.constant 0.000000e+00 : bf16
      %50 = vector.broadcast %cst_29 : bf16 to vector<1x128xbf16>
      %51 = arith.maximumf %49, %50 : vector<1x128xbf16>
      %c0_30 = arith.constant 0 : index
      %c0_31 = arith.constant 0 : index
      %52 = vector.load %arg15[%c0_30, %c0_31] : memref<1x128xf32, #tpu.memory_space<vmem>>, vector<1x128xf32>
      %c0_32 = arith.constant 0 : index
      %c0_33 = arith.constant 0 : index
      %53 = vector.load %arg5[%c0_32, %c0_33] : memref<128x384xbf16, #tpu.memory_space<vmem>>, vector<128x384xbf16>
      %cst_34 = arith.constant dense<0.000000e+00> : vector<1x384xf32>
      %54 = tpu.matmul %51, %53, %cst_34 {dimension_numbers = #tpu.dot_dimension_numbers<[1], [0], [0], [1], [0, 0, 1, 1], [], []>} : vector<1x128xbf16>, vector<128x384xbf16>, vector<1x384xf32> -> vector<1x384xf32>
      %c0_35 = arith.constant 0 : index
      %c0_36 = arith.constant 0 : index
      %55 = vector.load %arg7[%c0_35, %c0_36] : memref<1x384xf32, #tpu.memory_space<vmem>>, vector<1x384xf32>
      %56 = arith.addf %54, %55 : vector<1x384xf32>
      %57 = arith.truncf %52 : vector<1x128xf32> to vector<1x128xbf16>
      %c0_37 = arith.constant 0 : index
      %c0_38 = arith.constant 0 : index
      %58 = vector.load %arg6[%c0_37, %c0_38] : memref<128x384xbf16, #tpu.memory_space<vmem>>, vector<128x384xbf16>
      %cst_39 = arith.constant dense<0.000000e+00> : vector<1x384xf32>
      %59 = tpu.matmul %57, %58, %cst_39 {dimension_numbers = #tpu.dot_dimension_numbers<[1], [0], [0], [1], [0, 0, 1, 1], [], []>} : vector<1x128xbf16>, vector<128x384xbf16>, vector<1x384xf32> -> vector<1x384xf32>
      %c0_40 = arith.constant 0 : index
      %c0_41 = arith.constant 0 : index
      %60 = vector.load %arg8[%c0_40, %c0_41] : memref<1x384xf32, #tpu.memory_space<vmem>>, vector<1x384xf32>
      %61 = arith.addf %59, %60 : vector<1x384xf32>
      %62 = vector.extract_strided_slice %56 {offsets = [0, 0], sizes = [1, 128], strides = [1, 1]} : vector<1x384xf32> to vector<1x128xf32>
      %63 = vector.extract_strided_slice %61 {offsets = [0, 0], sizes = [1, 128], strides = [1, 1]} : vector<1x384xf32> to vector<1x128xf32>
      %64 = arith.addf %62, %63 : vector<1x128xf32>
      %65 = arith.negf %64 : vector<1x128xf32>
      %66 = math.exp %65 : vector<1x128xf32>
      %cst_42 = arith.constant 1.000000e+00 : f32
      %67 = vector.broadcast %cst_42 : f32 to vector<1x128xf32>
      %68 = arith.addf %67, %66 : vector<1x128xf32>
      %69 = arith.divf %67, %68 : vector<1x128xf32>
      %70 = vector.extract_strided_slice %56 {offsets = [0, 128], sizes = [1, 128], strides = [1, 1]} : vector<1x384xf32> to vector<1x128xf32>
      %71 = vector.extract_strided_slice %61 {offsets = [0, 128], sizes = [1, 128], strides = [1, 1]} : vector<1x384xf32> to vector<1x128xf32>
      %72 = arith.addf %70, %71 : vector<1x128xf32>
      %73 = arith.negf %72 : vector<1x128xf32>
      %74 = math.exp %73 : vector<1x128xf32>
      %cst_43 = arith.constant 1.000000e+00 : f32
      %75 = vector.broadcast %cst_43 : f32 to vector<1x128xf32>
      %76 = arith.addf %75, %74 : vector<1x128xf32>
      %77 = arith.divf %75, %76 : vector<1x128xf32>
      %78 = vector.extract_strided_slice %56 {offsets = [0, 256], sizes = [1, 128], strides = [1, 1]} : vector<1x384xf32> to vector<1x128xf32>
      %79 = vector.extract_strided_slice %61 {offsets = [0, 256], sizes = [1, 128], strides = [1, 1]} : vector<1x384xf32> to vector<1x128xf32>
      %80 = arith.mulf %69, %79 : vector<1x128xf32>
      %81 = arith.addf %78, %80 : vector<1x128xf32>
      %82 = math.tanh %81 : vector<1x128xf32>
      %cst_44 = arith.constant 1.000000e+00 : f32
      %83 = vector.broadcast %cst_44 : f32 to vector<1x128xf32>
      %84 = arith.subf %83, %77 : vector<1x128xf32>
      %85 = arith.mulf %84, %82 : vector<1x128xf32>
      %86 = arith.mulf %77, %52 : vector<1x128xf32>
      %87 = arith.addf %85, %86 : vector<1x128xf32>
      %c0_45 = arith.constant 0 : index
      %c0_46 = arith.constant 0 : index
      %88 = vector.load %arg15[%c0_45, %c0_46] : memref<1x128xf32, #tpu.memory_space<vmem>>, vector<1x128xf32>
      tpu.vector_store %arg15[%c0_45, %c0_46], %87 {strides = array<i32>} : memref<1x128xf32, #tpu.memory_space<vmem>>, vector<1x128xf32>,
      %cst_47 = arith.constant -1.000000e+30 : f32
      %89 = vector.broadcast %cst_47 : f32 to vector<1x1xf32>
      %c0_48 = arith.constant 0 : index
      %c0_49 = arith.constant 0 : index
      %90 = vector.load %arg13[%c0_48, %c0_49] : memref<1x1xf32, #tpu.memory_space<vmem>>, vector<1x1xf32>
      tpu.vector_store %arg13[%c0_48, %c0_49], %89 {strides = array<i32>} : memref<1x1xf32, #tpu.memory_space<vmem>>, vector<1x1xf32>,
      %cst_50 = arith.constant 0.000000e+00 : f32
      %91 = vector.broadcast %cst_50 : f32 to vector<1x1xf32>
      %c0_51 = arith.constant 0 : index
      %c0_52 = arith.constant 0 : index
      %92 = vector.load %arg14[%c0_51, %c0_52] : memref<1x1xf32, #tpu.memory_space<vmem>>, vector<1x1xf32>
      tpu.vector_store %arg14[%c0_51, %c0_52], %91 {strides = array<i32>} : memref<1x1xf32, #tpu.memory_space<vmem>>, vector<1x1xf32>,
    } else {
    }
    %c0 = arith.constant 0 : index
    %c0_4 = arith.constant 0 : index
    %8 = vector.load %arg15[%c0, %c0_4] : memref<1x128xf32, #tpu.memory_space<vmem>>, vector<1x32xf32>
    %9 = arith.truncf %8 : vector<1x32xf32> to vector<1x32xbf16>
    %c0_5 = arith.constant 0 : index
    %c0_6 = arith.constant 0 : index
    %10 = vector.load %arg9[%c0_5, %c0_6] : memref<32x128xbf16, #tpu.memory_space<vmem>>, vector<32x128xbf16>
    %cst = arith.constant dense<0.000000e+00> : vector<1x128xf32>
    %11 = tpu.matmul %9, %10, %cst {dimension_numbers = #tpu.dot_dimension_numbers<[1], [0], [0], [1], [0, 0, 1, 1], [], []>} : vector<1x32xbf16>, vector<32x128xbf16>, vector<1x128xf32> -> vector<1x128xf32>
    %c0_7 = arith.constant 0 : index
    %c0_8 = arith.constant 0 : index
    %12 = vector.load %arg10[%c0_7, %c0_8] : memref<1x128xf32, #tpu.memory_space<vmem>>, vector<1x128xf32>
    %13 = arith.addf %11, %12 : vector<1x128xf32>
    %c0_9 = arith.constant 0 : index
    %14 = arith.index_cast %arg1 : i32 to index
    %c0_10 = arith.constant 0 : index
    %c0_11 = arith.constant 0 : index
    %15 = vector.load %arg11[%c0_9, %14, %c0_10, %c0_11] : memref<1x1x1x128xf32, #tpu.memory_space<vmem>>, vector<1x1x1x128xf32>
    %16 = vector.shape_cast %15 : vector<1x1x1x128xf32> to vector<1x128xf32>
    %17 = vector.shape_cast %13 : vector<1x128xf32> to vector<1x1x1x128xf32>
    tpu.vector_store %arg11[%c0_9, %14, %c0_10, %c0_11], %17 {strides = array<i32>} : memref<1x1x1x128xf32, #tpu.memory_space<vmem>>, vector<1x1x1x128xf32>,
    %c0_12 = arith.constant 0 : index
    %c0_13 = arith.constant 0 : index
    %18 = vector.load %arg13[%c0_12, %c0_13] : memref<1x1xf32, #tpu.memory_space<vmem>>, vector<1x1xf32>
    %19 = vector.shape_cast %13 : vector<1x128xf32> to vector<1x1x128xf32>
    %cst_14 = arith.constant dense<0xFF800000> : vector<1xf32>
    %20 = vector.multi_reduction <maximumf>, %19, %cst_14 [1, 2] : vector<1x1x128xf32> to vector<1xf32>
    %21 = vector.shape_cast %20 : vector<1xf32> to vector<1x1x1xf32>
    %22 = vector.extract %21[0, 0, 0] : f32 from vector<1x1x1xf32>
    %23 = vector.broadcast %22 : f32 to vector<1x1xf32>
    %24 = arith.maximumf %18, %23 : vector<1x1xf32>
    %c0_15 = arith.constant 0 : index
    %c0_16 = arith.constant 0 : index
    %25 = vector.load %arg14[%c0_15, %c0_16] : memref<1x1xf32, #tpu.memory_space<vmem>>, vector<1x1xf32>
    %26 = arith.subf %18, %24 : vector<1x1xf32>
    %27 = math.exp %26 : vector<1x1xf32>
    %28 = arith.mulf %25, %27 : vector<1x1xf32>
    %29 = vector.broadcast %24 : vector<1x1xf32> to vector<1x128xf32>
    %30 = arith.subf %13, %29 : vector<1x128xf32>
    %31 = math.exp %30 : vector<1x128xf32>
    %32 = vector.shape_cast %31 : vector<1x128xf32> to vector<1x1x128xf32>
    %cst_17 = arith.constant dense<0.000000e+00> : vector<1xf32>
    %33 = vector.multi_reduction <add>, %32, %cst_17 [1, 2] : vector<1x1x128xf32> to vector<1xf32>
    %34 = vector.shape_cast %33 : vector<1xf32> to vector<1x1x1xf32>
    %35 = vector.extract %34[0, 0, 0] : f32 from vector<1x1x1xf32>
    %36 = vector.broadcast %35 : f32 to vector<1x1xf32>
    %37 = arith.addf %28, %36 : vector<1x1xf32>
    %c0_18 = arith.constant 0 : index
    %c0_19 = arith.constant 0 : index
    %38 = vector.load %arg14[%c0_18, %c0_19] : memref<1x1xf32, #tpu.memory_space<vmem>>, vector<1x1xf32>
    tpu.vector_store %arg14[%c0_18, %c0_19], %37 {strides = array<i32>} : memref<1x1xf32, #tpu.memory_space<vmem>>, vector<1x1xf32>,
    %c0_20 = arith.constant 0 : index
    %c0_21 = arith.constant 0 : index
    %39 = vector.load %arg13[%c0_20, %c0_21] : memref<1x1xf32, #tpu.memory_space<vmem>>, vector<1x1xf32>
    tpu.vector_store %arg13[%c0_20, %c0_21], %24 {strides = array<i32>} : memref<1x1xf32, #tpu.memory_space<vmem>>, vector<1x1xf32>,
    %c0_i32_22 = arith.constant 0 : i32
    %40 = arith.cmpi eq, %arg1, %c0_i32_22 : i32
    %41 = arith.extui %40 : i1 to i32
    %c0_i32_23 = arith.constant 0 : i32
    %42 = arith.cmpi ne, %41, %c0_i32_23 : i32
    scf.if %42 {
      %c0_26 = arith.constant 0 : index
      %c0_27 = arith.constant 0 : index
      %48 = vector.load %arg13[%c0_26, %c0_27] : memref<1x1xf32, #tpu.memory_space<vmem>>, vector<1x1xf32>
      %c0_28 = arith.constant 0 : index
      %c0_29 = arith.constant 0 : index
      %49 = vector.load %arg14[%c0_28, %c0_29] : memref<1x1xf32, #tpu.memory_space<vmem>>, vector<1x1xf32>
      %50 = math.log %49 : vector<1x1xf32>
      %51 = arith.addf %48, %50 : vector<1x1xf32>
      %c0_30 = arith.constant 0 : index
      %c0_31 = arith.constant 0 : index
      %c0_32 = arith.constant 0 : index
      %c0_33 = arith.constant 0 : index
      %52 = vector.load %arg11[%c0_30, %c0_31, %c0_32, %c0_33] : memref<1x1x1x128xf32, #tpu.memory_space<vmem>>, vector<1x1x1x128xf32>
      %53 = vector.shape_cast %51 : vector<1x1xf32> to vector<1x1x1x1xf32>
      %54 = vector.broadcast %53 : vector<1x1x1x1xf32> to vector<1x1x1x128xf32>
      %55 = arith.subf %52, %54 : vector<1x1x1x128xf32>
      %c0_34 = arith.constant 0 : index
      %c0_35 = arith.constant 0 : index
      %c0_36 = arith.constant 0 : index
      %c0_37 = arith.constant 0 : index
      %56 = vector.load %arg11[%c0_34, %c0_35, %c0_36, %c0_37] : memref<1x1x1x128xf32, #tpu.memory_space<vmem>>, vector<1x1x1x128xf32>
      tpu.vector_store %arg11[%c0_34, %c0_35, %c0_36, %c0_37], %55 {strides = array<i32>} : memref<1x1x1x128xf32, #tpu.memory_space<vmem>>, vector<1x1x1x128xf32>,
    } else {
    }
    %c7_i32 = arith.constant 7 : i32
    %43 = arith.cmpi eq, %arg0, %c7_i32 : i32
    %c0_i32_24 = arith.constant 0 : i32
    %44 = arith.cmpi eq, %arg1, %c0_i32_24 : i32
    %45 = arith.andi %43, %44 : i1
    %46 = arith.extui %45 : i1 to i32
    %c0_i32_25 = arith.constant 0 : i32
    %47 = arith.cmpi ne, %46, %c0_i32_25 : i32
    scf.if %47 {
      %c0_26 = arith.constant 0 : index
      %c0_27 = arith.constant 0 : index
      %48 = vector.load %arg15[%c0_26, %c0_27] : memref<1x128xf32, #tpu.memory_space<vmem>>, vector<1x128xf32>
      %c0_28 = arith.constant 0 : index
      %c0_29 = arith.constant 0 : index
      %49 = vector.load %arg12[%c0_28, %c0_29] : memref<1x128xf32, #tpu.memory_space<vmem>>, vector<1x128xf32>
      tpu.vector_store %arg12[%c0_28, %c0_29], %48 {strides = array<i32>} : memref<1x128xf32, #tpu.memory_space<vmem>>, vector<1x128xf32>,
    } else {
    }
    return
  }
  func.func @transform_0(%arg0: i32, %arg1: i32, %arg2: memref<8xi32, #tpu.memory_space<smem>>) -> (i32, i32, i32) {
    %0 = arith.index_cast %arg0 : i32 to index
    %1 = memref.load %arg2[%0] : memref<8xi32, #tpu.memory_space<smem>>
    %c0_i32 = arith.constant 0 : i32
    %c0_i32_0 = arith.constant 0 : i32
    %c0_i32_1 = arith.constant 0 : i32
    return %1, %c0_i32, %c0_i32_0 : i32, i32, i32
  }
  func.func @transform_1(%arg0: i32, %arg1: i32, %arg2: memref<8xi32, #tpu.memory_space<smem>>) -> (i32, i32) {
    %c0_i32 = arith.constant 0 : i32
    %c0_i32_0 = arith.constant 0 : i32
    %c0_i32_1 = arith.constant 0 : i32
    return %c0_i32, %c0_i32_0 : i32, i32
  }
  func.func @transform_2(%arg0: i32, %arg1: i32, %arg2: memref<8xi32, #tpu.memory_space<smem>>) -> (i32, i32) {
    %c0_i32 = arith.constant 0 : i32
    %c0_i32_0 = arith.constant 0 : i32
    %c0_i32_1 = arith.constant 0 : i32
    return %c0_i32, %c0_i32_0 : i32, i32
  }
  func.func @transform_3(%arg0: i32, %arg1: i32, %arg2: memref<8xi32, #tpu.memory_space<smem>>) -> (i32, i32) {
    %c0_i32 = arith.constant 0 : i32
    %c0_i32_0 = arith.constant 0 : i32
    %c0_i32_1 = arith.constant 0 : i32
    return %c0_i32, %c0_i32_0 : i32, i32
  }
  func.func @transform_4(%arg0: i32, %arg1: i32, %arg2: memref<8xi32, #tpu.memory_space<smem>>) -> (i32, i32) {
    %c0_i32 = arith.constant 0 : i32
    %c0_i32_0 = arith.constant 0 : i32
    %c0_i32_1 = arith.constant 0 : i32
    return %c0_i32, %c0_i32_0 : i32, i32
  }
  func.func @transform_5(%arg0: i32, %arg1: i32, %arg2: memref<8xi32, #tpu.memory_space<smem>>) -> (i32, i32) {
    %c0_i32 = arith.constant 0 : i32
    %c0_i32_0 = arith.constant 0 : i32
    %c0_i32_1 = arith.constant 0 : i32
    return %c0_i32, %c0_i32_0 : i32, i32
  }
  func.func @transform_6(%arg0: i32, %arg1: i32, %arg2: memref<8xi32, #tpu.memory_space<smem>>) -> (i32, i32) {
    %c0_i32 = arith.constant 0 : i32
    %c0_i32_0 = arith.constant 0 : i32
    return %c0_i32, %arg1 : i32, i32
  }
  func.func @transform_7(%arg0: i32, %arg1: i32, %arg2: memref<8xi32, #tpu.memory_space<smem>>) -> (i32, i32) {
    %c0_i32 = arith.constant 0 : i32
    %c0_i32_0 = arith.constant 0 : i32
    return %c0_i32, %arg1 : i32, i32
  }
  func.func @transform_8(%arg0: i32, %arg1: i32, %arg2: memref<8xi32, #tpu.memory_space<smem>>) -> (i32, i32, i32, i32) {
    %c0_i32 = arith.constant 0 : i32
    %c0_i32_0 = arith.constant 0 : i32
    %c0_i32_1 = arith.constant 0 : i32
    %c0_i32_2 = arith.constant 0 : i32
    return %arg0, %c0_i32, %c0_i32_0, %c0_i32_1 : i32, i32, i32, i32
  }
  func.func @transform_9(%arg0: i32, %arg1: i32, %arg2: memref<8xi32, #tpu.memory_space<smem>>) -> (i32, i32) {
    %c0_i32 = arith.constant 0 : i32
    %c0_i32_0 = arith.constant 0 : i32
    %c0_i32_1 = arith.constant 0 : i32
    return %c0_i32, %c0_i32_0 : i32, i32
  }
}

</mosaic_0001>

<bundles_post_ra>
// kernel: tpu_custom_call.1
= control target key start
LH: loop header
LB: loop body
LE: loop exit
PB: predicated region body
PF: predicated region fallthrough
CT: control target
= control target key end

     0   :  { %s2128_s0 = inlined_call_operand.vmem [shape: s32[8], index: 0, kind: input, shape index: {}]   ;;  %s2129_s1 = inlined_call_operand.vmem [shape: bf16[64,1,128], index: 1, kind: input, shape index: {}]   ;;  %s2130_s2 = inlined_call_operand.vmem [shape: f32[1,128], index: 2, kind: input, shape index: {}]   ;;  %s2131_s3 = inlined_call_operand.hbm [shape: bf16[128,384], index: 3, kind: input, shape index: {}]   ;;  %s2132_s4 = inlined_call_operand.hbm [shape: bf16[128,384], index: 4, kind: input, shape index: {}]   ;;  %s2133_s5 = inlined_call_operand.vmem [shape: f32[1,384], index: 5, kind: input, shape index: {}]   ;;  %s2134_s6 = inlined_call_operand.vmem [shape: f32[1,384], index: 6, kind: input, shape index: {}]   ;;  %s2135_s7 = inlined_call_operand.vmem [shape: bf16[32,128], index: 7, kind: input, shape index: {}]   ;;  %s2136_s8 = inlined_call_operand.vmem [shape: f32[1,128], index: 8, kind: input, shape index: {}]   ;;  %s2137_s9 = inlined_call_operand.hbm [shape: f32[8,1,1,128], index: 9, kind: output, shape index: {0}]   ;;  %s2138_s10 = inlined_call_operand.hbm [shape: f32[1,128], index: 10, kind: output, shape index: {1}]  }
   0x1   :  { %s16_s15 = sshll.u32 %s2128_s0, 4  ;;  %s17_s15 = int_to_ptr.vmem [resolvable:$true] %s16_s15 }
   0x2   :  { %s1578_s16 = scalar_lea.vmem %s17_s15, 16  ;;  %p1583_p1 = scmp.lt.s32.totalorder %s17_s15, %s17_s15 }
   0x3   :  { %p1579_p0 = scmp.ne.s32.totalorder %s17_s15, %s1578_s16  ;;  %p1584_p2 = scmp.lt.s32.totalorder %s1578_s16, %s1578_s16 }
   0x5   :  { %p1585_p3 = por %p1584_p2, %p1583_p1 }
   0x7   :  { %p1586_p4 = pnand %p1585_p3, %p1579_p0 }
   0x9   :  { %1589 = shalt.err (!%p1586_p4)  }
   0xa   :  { %s1766_s17 = smov [#allocation6]  }
   0xb   :  { %19 = dma.vmem_to_smem %s17_s15, 16, %s1766_s17, [#allocation5] }
   0xc   :  { %1724 = dma.done.wait [#allocation5], 16 }
   0xd   :  { %1725 = vsyncadd [#allocation5], 4294967280 }
   0xe   :  { %21 = sfence }
   0xf   :  { %22 = vsyncpa [#allocation8], 0 }
  0x10   :  { %23 = vsyncpa [#allocation11], 0 }
  0x11   :  { %24 = vsyncpa [#allocation9], 0 }
  0x12   :  { %26 = vsyncpa [#allocation9 + $0x1], 0 }
  0x13   :  { %27 = vsyncpa [#allocation14], 0  ;;  %s1835_s18 = smov 0   ;;  %s1837_s0 = smov 0  }
  0x14   :  { %s1839_s19 = smov 0   ;;  %s1841_s20 = smov 0  }
  0x15   :  { %s1843_s21 = smov 0   ;;  %s1845_s22 = smov 0  }
  0x16 LB: > { %2150 = sst [smem:[#allocation20_spill]] %s1744_s18  ;;  %s1250_s23 = sadd.s32 4294967295, %s1764_s22   ;;  %s1764_s22 = sphi %s1845_s22, %s33_s22   ;;  %s1760_s21 = sphi %s1843_s21, %s2172_s21   ;;  %s1756_s20 = sphi %s1841_s20, %s2171_s20   ;;  %s1752_s19 = sphi %s1839_s19, %s2170_s19   ;;  %s1748_s0 = sphi %s1837_s0, %s2174_s0   ;;  %s1744_s18 = sphi %s1835_s18, %s2173_s18  }
  0x17   : > { %2151 = sst [smem:[#allocation21_spill]] %s1752_s19  ;;  %s1251_s24 = sadd.s32 4294967294, %s1764_s22  }
  0x18   : > { %2152 = sst [smem:[#allocation22_spill]] %s1760_s21  ;;  %s45_s25 = sadd.s32 1, %s1760_s21 }
  0x19   : > { %s237_s26 = sadd.s32 1, %s1752_s19  ;;  %p47_p5 = scmp.ge.s32.totalorder %s45_s25, 8 }
  0x1a   : > { %p247_p6 = scmp.ne.s32.totalorder %s1752_s19, %s1748_s0  ;;  %p1871_p7 = scmp.eq.s32.totalorder %s1250_s23, 7 }
  0x1b   : > { %p253_p8 = scmp.ne.s32.totalorder %s1748_s0, %s1744_s18  ;;  %s2176_s25 = smov (%p47_p5, %s45_s25), 0 }
  0x1c   : > { %s2153_s27 = scalar_select %p1871_p7, 1, 0 }
  0x1d   : > { %2154 = sst [smem:[#allocation23_spill]] %s2176_s25  ;;  %p1881_p9 = por %p1871_p7, %p247_p6 }
  0x1e   : > { %p254_p10 = scmp.eq.s32.totalorder %s1251_s24, 7  ;;  %s234_s29 = ssub.s32 %s1760_s21, %s2176_s25 }
  0x1f   : > { %s2155_s28 = scalar_select %p1881_p9, 1, 0 }
  0x20   : > { %p1252_p11 = scmp.ge.s32.totalorder %s1764_s22, 1  ;;  %p235_p12 = scmp.eq.s32.totalorder %s234_s29, 0 }
  0x21   : > { %p1888_p13 = por %p254_p10, %p253_p8  ;;  %p282_p0 = scmp.lt.s32.totalorder %s1764_s22, 9 }
  0x22   : > { %s1894_s11 = scalar_select %p235_p12, %s1752_s19, %s237_s26  }
  0x23   : > { %s2156_s30 = scalar_select %p1888_p13, 1, 0 }
  0x24   : > { %2158 = sst [smem:[#allocation25_spill]] %s1894_s11  ;;  %p1896_p1 = pnand %p1252_p11, %p282_p0 }
  0x25   : > { %2157 = sst [smem:[#allocation24_spill]] %s2156_s30  ;;  %p1900_p2 = scmp.eq.s32.totalorder %s1250_s23, 0 }
  0x26   : > { %s2159_s12 = scalar_select %p1896_p1, 1, 0 }
  0x27   : > { %s2160_s13 = scalar_select %p1900_p2, 1, 0 }
  0x28   : > { %p1418_p3 = pneg %p1896_p1  ;;  %s1767_s14 = smov [#allocation7]  }
  0x29   : > { %s297_s15 = sshll.u32 %s1767_s14, 4  ;;  %s1768_s17 = smov [#allocation10]   ;;  %s298_s15 = int_to_ptr.vmem [resolvable:$true] %s297_s15 }
  0x2a   : > { %p1908_p4 = pnand %p1900_p2, %p1418_p3  ;;  %s310_s24 = sshll.u32 %s1768_s17, 4  ;;  %s1912_s24 = int_to_ptr.vmem [resolvable:$true] %s310_s24 }
  0x2b   : > { %s1590_s29 = scalar_lea.hbm %s2131_s3, 3072 }
  0x2c   : > { %p1591_p5 = scmp.ne.s32.totalorder %s2131_s3, %s1590_s29  ;;  %p1592_p6 = pneg %p1908_p4 }
  0x2d   : > { %p1597_p11 = scmp.lt.u32.totalorder %s1590_s29, %s2131_s3 }
  0x2e   : > { %p1593_p8 = pnand %p1592_p6, %p1591_p5 }
  0x30   : > { %p1594_p10 = pneg %p1593_p8 }
  0x32   : > { %p1599_p12 = pnand %p1597_p11, %p1594_p10 }
  0x34   : > { %1602 = shalt.err (!%p1599_p12)
}
  0x35   : > { %s1603_s17 = scalar_lea.vmem %s298_s15, 3072  ;;  %p1611_p7 = scmp.lt.s32.totalorder %s298_s15, %s298_s15 }
  0x36   : > { %p1604_p0 = scmp.ne.s32.totalorder %s298_s15, %s1603_s17  ;;  %p1612_p9 = scmp.lt.s32.totalorder %s1603_s17, %s1603_s17 }
  0x38   : > { %p1606_p3 = pnand %p1604_p0, %p1592_p6  ;;  %p1613_p2 = por %p1612_p9, %p1611_p7 }
  0x3a   : > { %p1607_p13 = pneg %p1606_p3 }
  0x3c   : > { %p1614_p1 = pnand %p1613_p2, %p1607_p13 }
  0x3e   : > { %1617 = shalt.err (!%p1614_p1)
}
  0x3f   : > { %s1769_s21 = smov 192   ;;  %s1770_s25 = smov 12  }
  0x40   : > { %1421 = dma.hbm_to_vmem [thread:$0]  (!%p1908_p4), %s2131_s3, 3072, %s298_s15, [#allocation8], %s1769_s21, %s1769_s21, %s1770_s25  }
  0x41   : > { %s1618_s14 = scalar_lea.hbm %s2132_s4, 3072 }
  0x42   : > { %p1619_p5 = scmp.ne.s32.totalorder %s2132_s4, %s1618_s14  ;;  %p1625_p13 = scmp.lt.u32.totalorder %s1618_s14, %s2132_s4 }
  0x44   : > { %p1621_p7 = pnand %p1619_p5, %p1592_p6 }
  0x46   : > { %p1622_p9 = pneg %p1621_p7 }
  0x48   : > { %p1627_p1 = pnand %p1625_p13, %p1622_p9 }
  0x4a   : > { %1630 = shalt.err (!%p1627_p1)
}
  0x4b   : > { %s1631_s15 = scalar_lea.vmem %s1912_s24, 3072  ;;  %p1639_p11 = scmp.lt.s32.totalorder %s1912_s24, %s1912_s24 }
  0x4c   : > { %p1632_p2 = scmp.ne.s32.totalorder %s1912_s24, %s1631_s15  ;;  %p1640_p12 = scmp.lt.s32.totalorder %s1631_s15, %s1631_s15 }
  0x4e   : > { %p1634_p8 = pnand %p1632_p2, %p1592_p6  ;;  %p1641_p0 = por %p1640_p12, %p1639_p11 }
  0x50   : > { %p1635_p10 = pneg %p1634_p8 }
  0x52   : > { %p1642_p3 = pnand %p1641_p0, %p1635_p10 }
  0x54   : > { %1645 = shalt.err (!%p1642_p3)
}
  0x55   : > { %1424 = dma.hbm_to_vmem [thread:$0]  (!%p1908_p4), %s2132_s4, 3072, %s1912_s24, [#allocation11], %s1769_s21, %s1769_s21, %s1770_s25  }
  0x56   : > { %p2162_p5 = scmp.ne.s32.totalorder %s2159_s12, 0 }
  0x57   : > { %p2163_p7 = scmp.ne.s32.totalorder (!%p2162_p5), %s2160_s13, 0 }
  0x58   : > { %353 = sbr.rel (%p2162_p5) target bundleno = 1425 (0x591), region = 52 }
  0x5f   : > { %1727 = dma.done.wait (%p2163_p7), [#allocation8], 3072  }
  0x60   : > { %1729 = vsyncadd (%p2163_p7), [#allocation8], 4294964224 }
  0x61   : > { %1731 = dma.done.wait (%p2163_p7), [#allocation11], 3072  }
  0x62   : > { %1733 = vsyncadd (%p2163_p7), [#allocation11], 4294964224  ;;  %s394_s30 = sand.u32 1, %s1748_s0   ;;  %p411_p4 = scmp.eq.s32.totalorder %s1756_s20, 0 }
  0x63   : > { %s398_s12 = sld [smem:[#allocation6 + %s1756_s20]]  ;;  %s1982_s25 = scalar_lea.vmem [#allocation12], %s394_s30  ;;  %v417_v0 = vld [vmem:[%s2130_s2] sm:$0x1] (%p411_p4) }
  0x64   : > { %418 = vst [vmem:[#allocation4] sm:$0x1] (%p411_p4), %v417_v0 }
  0x66   : > { %416 = sbr.rel (!%p411_p4) target bundleno = 109 (0x6d), region = 64 }
  0x69   : > { %p399_p6 = scmp.lt.s32.totalorder %s398_s12, 63 }
  0x6b   : > { %s2178_s12 = smov (!%p399_p6, %s398_s12), 63 }
  0x6c   : > { %s401_s21 = scalar_lea.vmem %s2129_s1, %s2178_s12 }
  0x6d PF: > { %v1496_v1 = vld [vmem:[#allocation7 + $0x4] ss:$12 sps:$4 sm:$0xff]   ;;  %v1498_v2 = vld [vmem:[#allocation7] ss:$12 sps:$4 sm:$0xff]   ;;  %v1771_v3 = vmov 0.0   ;;  %v1772_v4 = vmov 0   ;;  %v587_v61 = vlaneseq }
  0x6e   : > { %1344 = vmatprep.subr.bf16.mxu1 %v1771_v3  ;;  %634 = vmatprep.mubr.bf16.mxu0 %v1772_v4  ;;  %v1499_v5 = vld [vmem:[#allocation7 + $0x1c] ss:$12 sps:$4 sm:$0xff]   ;;  %vm1773_vm0 = vmmov 0   ;;  %v1501_v6 = vld [vmem:[#allocation7 + $0x18] ss:$12 sps:$4 sm:$0xff]   ;;  %vm986_vm1 = vcmask 261120  }
  0x6f   : > { %602 = vmatprep.subr.bf16.mxu0 %v1496_v1  ;;  %1360 = vmatprep.mubr.msk.bf16.mxu1 %vm1773_vm0, %v1771_v3  ;;  %v1502_v7 = vld [vmem:[#allocation7 + $0x34] ss:$12 sps:$4 sm:$0xff]   ;;  %v1504_v8 = vld [vmem:[#allocation7 + $0x30] ss:$12 sps:$4 sm:$0xff]   ;;  %v1505_v9 = vld [vmem:[#allocation7 + $0x4c] ss:$12 sps:$4 sm:$0xff]  }
  0x70   : > { %603 = vmatpush1.bf16.msra.mxu0 %v1498_v2  ;;  %1494 = vset.pattern.permute.xlu0 %v1772_v4  ;;  %v1516_v10 = vld [vmem:[#allocation7 + $0x8] ss:$12 sps:$4 sm:$0xff]   ;;  %v1508_v12 = vld [vmem:[#allocation7 + $0x64] ss:$12 sps:$4 sm:$0xff]   ;;  %v1520_v13 = vld [vmem:[#allocation7 + $0x20] ss:$12 sps:$4 sm:$0xff]  }
  0x71   : > { %604 = vmatprep.subr.bf16.mxu0 %v1499_v5  ;;  %1495 = vset.pattern.permute.xlu1 %v1772_v4  ;;  %v1507_v11 = vld [vmem:[#allocation7 + $0x48] ss:$12 sps:$4 sm:$0xff]   ;;  %v1510_v14 = vld [vmem:[#allocation7 + $0x60] ss:$12 sps:$4 sm:$0xff]   ;;  %v1522_v15 = vld [vmem:[#allocation7 + $0x38] ss:$12 sps:$4 sm:$0xff]  }
  0x72   : > { %1345 = vmatpush3.bf16.msra.mxu1 %v1516_v10  ;;  %v1511_v16 = vld [vmem:[#allocation7 + $0x7c] ss:$12 sps:$4 sm:$0xff]   ;;  %v1513_v17 = vld [vmem:[#allocation7 + $0x78] ss:$12 sps:$4 sm:$0xff]   ;;  %v1514_v19 = vld [vmem:[#allocation7 + $0x94] ss:$12 sps:$4 sm:$0xff]  }
  0x73   : > { %1346 = vmatprep.subr.bf16.mxu1 %v1771_v3  ;;  %v1526_v18 = vld [vmem:[#allocation7 + $0x50] ss:$12 sps:$4 sm:$0xff]   ;;  %v1530_v21 = vld [vmem:[#allocation7 + $0x68] ss:$12 sps:$4 sm:$0xff]   ;;  %v1518_v22 = vld [vmem:[#allocation7 + $0xac] ss:$12 sps:$4 sm:$0xff]  }
  0x74   : > { %605 = vmatpush1.bf16.msra.mxu0 %v1501_v6  ;;  %v1517_v20 = vld [vmem:[#allocation7 + $0x90] ss:$12 sps:$4 sm:$0xff]   ;;  %v1521_v23 = vld [vmem:[#allocation7 + $0xa8] ss:$12 sps:$4 sm:$0xff]   ;;  %v1534_v25 = vld [vmem:[#allocation7 + $0x80] ss:$12 sps:$4 sm:$0xff]  }
  0x75   : > { %606 = vmatprep.subr.bf16.mxu0 %v1502_v7  ;;  %v422_v24 = vld [vmem:[%s401_s21] sm:$0x1]  ;;  %v1525_v26 = vld [vmem:[#allocation10 + $0x4] ss:$12 sps:$4 sm:$0xff]   ;;  %v1523_v28 = vld [vmem:[#allocation10] ss:$12 sps:$4 sm:$0xff]  }
  0x76   : > { %1347 = vmatpush3.bf16.msra.mxu1 %v1520_v13  ;;  %v423_v27 = vmax.bf16 %v1772_v4, %v422_v24  ;;  %v1538_v29 = vld [vmem:[#allocation7 + $0x98] ss:$12 sps:$4 sm:$0xff]   ;;  %v1529_v30 = vld [vmem:[#allocation10 + $0x1c] ss:$12 sps:$4 sm:$0xff]   ;;  %v1533_v33 = vld [vmem:[#allocation10 + $0x34] ss:$12 sps:$4 sm:$0xff]  }
  0x77   : > { %1348 = vmatprep.subr.bf16.mxu1 %v1771_v3  ;;  %v1527_v31 = vld [vmem:[#allocation10 + $0x18] ss:$12 sps:$4 sm:$0xff]   ;;  %v1542_v32 = vld [vmem:[#allocation7 + $0xb0] ss:$12 sps:$4 sm:$0xff]   ;;  %v1549_v35 = vld [vmem:[#allocation10 + $0x8] ss:$12 sps:$4 sm:$0xff]  }
  0x78   : > { %607 = vmatpush1.bf16.msra.mxu0 %v1504_v8  ;;  %v1531_v34 = vld [vmem:[#allocation10 + $0x30] ss:$12 sps:$4 sm:$0xff]   ;;  %v1537_v36 = vld [vmem:[#allocation10 + $0x4c] ss:$12 sps:$4 sm:$0xff]   ;;  %v1535_v37 = vld [vmem:[#allocation10 + $0x48] ss:$12 sps:$4 sm:$0xff]  }
  0x79   : > { %608 = vmatprep.subr.bf16.mxu0 %v1505_v9  ;;  %v1553_v38 = vld [vmem:[#allocation10 + $0x20] ss:$12 sps:$4 sm:$0xff]   ;;  %v1541_v39 = vld [vmem:[#allocation10 + $0x64] ss:$12 sps:$4 sm:$0xff]   ;;  %v1545_v42 = vld [vmem:[#allocation10 + $0x7c] ss:$12 sps:$4 sm:$0xff]  }
  0x7a   : > { %1349 = vmatpush3.bf16.msra.mxu1 %v1522_v15  ;;  %v1539_v40 = vld [vmem:[#allocation10 + $0x60] ss:$12 sps:$4 sm:$0xff]   ;;  %v1554_v41 = vld [vmem:[#allocation10 + $0x38] ss:$12 sps:$4 sm:$0xff]   ;;  %v1555_v44 = vld [vmem:[#allocation10 + $0x50] ss:$12 sps:$4 sm:$0xff]  }
  0x7b   : > { %1350 = vmatprep.subr.bf16.mxu1 %v1771_v3  ;;  %v1543_v43 = vld [vmem:[#allocation10 + $0x78] ss:$12 sps:$4 sm:$0xff]   ;;  %v1548_v45 = vld [vmem:[#allocation10 + $0x94] ss:$12 sps:$4 sm:$0xff]   ;;  %v1546_v46 = vld [vmem:[#allocation10 + $0x90] ss:$12 sps:$4 sm:$0xff]  }
  0x7c   : > { %609 = vmatpush1.bf16.msra.mxu0 %v1507_v11  ;;  %v1556_v47 = vld [vmem:[#allocation10 + $0x68] ss:$12 sps:$4 sm:$0xff]   ;;  %v1552_v48 = vld [vmem:[#allocation10 + $0xac] ss:$12 sps:$4 sm:$0xff]   ;;  %v2014_v50 = vld [vmem:[#allocation4] sm:$0x1] }
  0x7d   : > { %610 = vmatprep.subr.bf16.mxu0 %v1508_v12  ;;  %v1550_v49 = vld [vmem:[#allocation10 + $0xa8] ss:$12 sps:$4 sm:$0xff]   ;;  %v1557_v51 = vld [vmem:[#allocation10 + $0x80] ss:$12 sps:$4 sm:$0xff]   ;;  %v683_v52 = vpack.c.bf16 %v2014_v50, %v2014_v50  ;;  %v1558_v53 = vld [vmem:[#allocation10 + $0x98] ss:$12 sps:$4 sm:$0xff]  }
  0x7e   : > { %1351 = vmatpush3.bf16.msra.mxu1 %v1526_v18  ;;  %v1559_v54 = vld [vmem:[#allocation10 + $0xb0] ss:$12 sps:$4 sm:$0xff]   ;;  %v1561_v56 = vld [vmem:[%s2135_s7 + $0x8] sm:$0xff]   ;;  %v588_v62 = vshrl.u32 %v587_v61, 7  ;;  %vm1033_vm2 = vcmask 1040384   ;;  %vm964_vm3 = vcmask 0  }
  0x7f   : > { %1352 = vmatprep.subr.bf16.mxu1 %v1771_v3  ;;  %v1560_v55 = vld [vmem:[%s2135_s7] sm:$0xff]   ;;  %966 = vst.msk [vmem:[#allocation3] sm:$0x1] %vm964_vm3, %v1771_v3  ;;  %p1098_p9 = scmp.eq.s32.totalorder %s1756_s20, 7 }
  0x80   : > { %611 = vmatpush1.bf16.msra.mxu0 %v1510_v14  ;;  %v2031_v63 = vsub.s32 0, %v588_v62  ;;  %v716_v0 = vld [vmem:[%s2134_s6] sm:$0x7]  ;;  %v593_v2 = vsub.s32 1, %v588_v62  ;;  %v597_v24 = vsub.s32 2, %v588_v62 }
  0x81   : > { %612 = vmatprep.subr.bf16.mxu0 %v1511_v16  ;;  %v457_v1 = vld [vmem:[%s2133_s5] sm:$0x7] }
  0x82   : > { %1353 = vmatpush3.bf16.msra.mxu1 %v1530_v21  ;;  %v849_v5 = vrot.slane %v716_v0, %v2031_v63  ;;  %v594_v6 = vrot.slane %v457_v1, %v593_v2  ;;  %v853_v7 = vrot.slane %v716_v0, %v593_v2 }
  0x83   : > { %1354 = vmatprep.subr.bf16.mxu1 %v1771_v3 }
  0x84   : > { %613 = vmatpush1.bf16.msra.mxu0 %v1513_v17  ;;  %v1394_v10 = vadd.f32 %v853_v7, %v594_v6 }
  0x85   : > { %614 = vmatprep.subr.bf16.mxu0 %v1514_v19 }
  0x86   : > { %1355 = vmatpush3.bf16.msra.mxu1 %v1534_v25  ;;  %v857_v25 = vrot.slane %v716_v0, %v597_v24 }
  0x87   : > { %1356 = vmatprep.subr.bf16.mxu1 %v1771_v3 }
  0x88   : > { %615 = vmatpush1.bf16.msra.mxu0 %v1517_v20 }
  0x89   : > { %616 = vmatprep.subr.bf16.mxu0 %v1518_v22 }
  0x8a   : > { %1357 = vmatpush3.bf16.msra.mxu1 %v1538_v29 }
  0x8b   : > { %1358 = vmatprep.subr.bf16.mxu1 %v1771_v3 }
  0x8c   : > { %617 = vmatpush1.bf16.msra.mxu0 %v1521_v23 }
  0x8d   : > { %861 = vmatprep.subr.bf16.mxu0 %v1525_v26 }
  0x8e   : > { %1359 = vmatpush3.bf16.msra.mxu1 %v1542_v32 }
  0x8f   : > { %635 = vmatmul.mubr.bf16.vlgmr.msra.gmra.mrb[0].mxu0 %v423_v27  ;;  %1364 = vmatprep.subr.bf16.mxu1 %v1771_v3 }
  0x90   : > { %862 = vmatpush1.bf16.msra.mxu0 %v1523_v28  ;;  %893 = vmatprep.mubr.bf16.mxu0 %v1772_v4  ;;  %v590_v4 = vrot.slane %v457_v1, %v2031_v63 }
  0x91   : > { %863 = vmatprep.subr.bf16.mxu0 %v1529_v30  ;;  %1361 = vmatmul.mubr.bf16.vlgmr.msra.gmra.mrb[0].mxu1 %v423_v27  ;;  %v598_v27 = vrot.slane %v457_v1, %v597_v24 }
  0x92   : > { %1365 = vmatpush3.bf16.msra.mxu1 %v1549_v35  ;;  %1380 = vmatprep.mubr.msk.bf16.mxu1 %vm1773_vm0, %v1771_v3  ;;  %v1392_v8 = vadd.f32 %v849_v5, %v590_v4 }
  0x93   : > { %1366 = vmatprep.subr.bf16.mxu1 %v1771_v3 }
  0x94   : > { %864 = vmatpush1.bf16.msra.mxu0 %v1527_v31 }
  0x95   : > { %865 = vmatprep.subr.bf16.mxu0 %v1533_v33 }
  0x96   : > { %1367 = vmatpush3.bf16.msra.mxu1 %v1553_v38 }
  0x97   : > { %1368 = vmatprep.subr.bf16.mxu1 %v1771_v3 }
  0x98   : > { %866 = vmatpush1.bf16.msra.mxu0 %v1531_v34 }
  0x99   : > { %867 = vmatprep.subr.bf16.mxu0 %v1537_v36 }
  0x9a   : > { %1369 = vmatpush3.bf16.msra.mxu1 %v1554_v41 }
  0x9b   : > { %1370 = vmatprep.subr.bf16.mxu1 %v1771_v3 }
  0x9c   : > { %868 = vmatpush1.bf16.msra.mxu0 %v1535_v37 }
  0x9d   : > { %869 = vmatprep.subr.bf16.mxu0 %v1541_v39 }
  0x9e   : > { %1371 = vmatpush3.bf16.msra.mxu1 %v1555_v44 }
  0x9f   : > { %1372 = vmatprep.subr.bf16.mxu1 %v1771_v3 }
  0xa0   : > { %870 = vmatpush1.bf16.msra.mxu0 %v1539_v40 }
  0xa1   : > { %871 = vmatprep.subr.bf16.mxu0 %v1545_v42  ;;  %v973_v42 = vld [vmem:[%s2136_s8] sm:$0x1] }
  0xa2   : > { %1373 = vmatpush3.bf16.msra.mxu1 %v1556_v47 }
  0xa3   : > { %1374 = vmatprep.subr.bf16.mxu1 %v1771_v3 }
  0xa4   : > { %872 = vmatpush1.bf16.msra.mxu0 %v1543_v43 }
  0xa5   : > { %873 = vmatprep.subr.bf16.mxu0 %v1548_v45 }
  0xa6   : > { %1375 = vmatpush3.bf16.msra.mxu1 %v1557_v51 }
  0xa7   : > { %1376 = vmatprep.subr.bf16.mxu1 %v1771_v3 }
  0xa8   : > { %874 = vmatpush1.bf16.msra.mxu0 %v1546_v46 }
  0xa9   : > { %875 = vmatprep.subr.bf16.mxu0 %v1552_v48 }
  0xaa   : > { %1377 = vmatpush3.bf16.msra.mxu1 %v1558_v53 }
  0xab   : > { %1378 = vmatprep.subr.bf16.mxu1 %v1771_v3 }
  0xac   : > { %876 = vmatpush1.bf16.msra.mxu0 %v1550_v49  ;;  %v1774_v49 = vmov -1e+30  }
  0xad   : > { %1384 = vmatprep.subr.bf16.mxu0 %v1771_v3  ;;  %965 = vst.msk [vmem:[#allocation2] sm:$0x1] %vm964_vm3, %v1774_v49 }
  0xae   : > { %1379 = vmatpush3.bf16.msra.mxu1 %v1559_v54 }
  0xaf   : > { %894 = vmatmul.mubr.bf16.vlgmr.msra.gmra.mrb[0].mxu0 %v683_v52 }
  0xb0   : > { %1388 = vmatprep.mubr.msk.bf16.mxu0 %vm1773_vm0, %v1771_v3  ;;  %1385 = vmatpush3.bf16.msra.mxu0 %v1560_v55 }
  0xb1   : > { %1381 = vmatmul.mubr.bf16.vlgmr.msra.gmra.mrb[4].mxu1 %v683_v52  ;;  %1386 = vmatprep.subr.bf16.mxu0 %v1771_v3 }
  0xb4   : > { %1387 = vmatpush3.bf16.msra.mxu0 %v1561_v56 }
 0x164   : > { %v677_v57 = vpop.f32.mrb[0].mxu1 }
 0x165   : > { %v1362_v58 = vpop.f32.mrb[1].mxu1  ;;  %v678_v31 = vadd.f32 %v677_v57, %v598_v27  ;;  %v1032_v57 = vld [vmem:[#allocation2] sm:$0x1] }
 0x166   : > { %v680_v59 = vpop.f32.mrb[2].mxu1 }
 0x167   : > { %v1363_v60 = vpop.f32.mrb[3].mxu1 }
 0x182   : > { %v895_v9 = vpop.f32.mrb[0].mxu0 }
 0x183   : > { %v1393_v11 = vadd.f32 %v1392_v8, %v895_v9  ;;  %v897_v12 = vpop.f32.mrb[1].mxu0 }
 0x184   : > { %v899_v13 = vpop.f32.mrb[2].mxu0  ;;  %v1395_v16 = vadd.f32 %v1394_v10, %v897_v12  ;;  %v936_v18 = vpop.f32.mrb[4].mxu1 }
 0x185   : > { %v1310_v14 = vmul.f32 -1.442695, %v1393_v11  ;;  %v900_v15 = vpop.f32.mrb[3].mxu0  ;;  %v1382_v19 = vpop.f32.mrb[5].mxu1  ;;  %v937_v29 = vadd.f32 %v936_v18, %v857_v25  ;;  %v1046_v13 = vld [vmem:[#allocation3] sm:$0x1] }
 0x186   : > { %v1311_v17 = vmul.f32 -1.442695, %v1395_v16  ;;  %v939_v20 = vpop.f32.mrb[6].mxu1 }
 0x187   : > { %1562 = vpow2.f32 %v1310_v14  ;;  %v1383_v21 = vpop.f32.mrb[7].mxu1 }
 0x188   : > { %1564 = vpow2.f32 %v1311_v17 }
 0x191   : > { %v1563_v22 = vpop.eup %1562 }
 0x192   : > { %v946_v23 = vadd.f32 1.0, %v1563_v22  ;;  %v1565_v26 = vpop.eup %1564 }
 0x193   : > { %v953_v28 = vadd.f32 1.0, %v1565_v26 }
 0x194   : > { %1566 = vrcp.f32 %v946_v23 }
 0x195   : > { %1568 = vrcp.f32 %v953_v28 }
 0x19e   : > { %v1567_v30 = vpop.eup %1566 }
 0x19f   : > { %v956_v32 = vmul.f32 %v1567_v30, %v937_v29  ;;  %v1569_v34 = vpop.eup %1568 }
 0x1a0   : > { %v959_v35 = vsub.f32 1.0, %v1569_v34  ;;  %v961_v37 = vmul.f32 %v1569_v34, %v2014_v50 }
 0x1a1   : > { %v957_v33 = vadd.f32 %v956_v32, %v678_v31 }
 0x1a3   : > { %1570 = vtanh.f32 %v957_v33 }
 0x1ad   : > { %v1571_v36 = vpop.eup %1570 }
 0x1ae   : > { %v960_v38 = vmul.f32 %v1571_v36, %v959_v35 }
 0x1b0   : > { %v962_v39 = vadd.f32 %v961_v37, %v960_v38 }
 0x1b2   : > { %963 = vst [vmem:[#allocation4] sm:$0x1] %v962_v39 }
 0x1b9   : > { %v967_v40 = vld [vmem:[#allocation4] sm:$0x1] }
 0x1ba   : > { %v968_v41 = vpack.c.bf16 %v967_v40, %v967_v40  ;;  %v1103_v26 = vld [vmem:[#allocation4] sm:$0x1] (%p1098_p9) }
 0x1bb   : > { %1104 = vst [vmem:[#allocation13] sm:$0x1] (%p1098_p9), %v1103_v26 }
 0x1bc   : > { %1389 = vmatmul.mubr.msk.bf16.vlgmr.msra.gmra.mrb[4].mxu0 %vm986_vm1, %v968_v41 }
 0x28f   : > { %v1024_v43 = vpop.f32.mrb[4].mxu0 }
 0x290   : > { %v1025_v44 = vadd.f32 %v1024_v43, %v973_v42  ;;  %v1390_v45 = vpop.f32.mrb[5].mxu0 }
 0x291   : > { %v1027_v46 = vpop.f32.mrb[6].mxu0 }
 0x292   : > { %1031 = vst [vmem:[%s1982_s25] sm:$0x1] %v1025_v44  ;;  %v1391_v47 = vpop.f32.mrb[7].mxu0  ;;  %v1034_v48 = vsel %vm1033_vm2, %v1025_v44, -inf }
 0x293   : > { %1035 = vmax.xlane.f32.xlu0 %v1034_v48 }
 0x299   : > { %v1086_v24 = vld [vmem:[%s1982_s25] sm:$0x1] }
 0x320   : > { %v1036_v50 = vpop.xlane.xlu0 %1035 }
 0x321   : > { %v1037_v51 = vrot.slane %v1036_v50, 4 }
 0x323   : > { %v1038_v52 = vmax.f32 %v1036_v50, %v1037_v51 }
 0x325   : > { %v1039_v53 = vrot.slane %v1038_v52, 2 }
 0x327   : > { %v1040_v54 = vmax.f32 %v1038_v52, %v1039_v53 }
 0x329   : > { %v1041_v55 = vrot.slane %v1040_v54, 1 }
 0x32b   : > { %v1042_v56 = vmax.f32 %v1040_v54, %v1041_v55 }
 0x32d   : > { %1400 = vpush %v1042_v56 }
 0x35e   : > { %s1401_s13 = spop %1400 }
 0x35f   : > { %v1044_v58 = vstv %s1401_s13 }
 0x360   : > { %v1045_v59 = vmax.f32 %v1032_v57, %v1044_v58 }
 0x362   : > { %v1047_v60 = vsub.f32 %v1032_v57, %v1045_v59  ;;  %1077 = vst.msk [vmem:[#allocation2] sm:$0x1] %vm964_vm3, %v1045_v59  ;;  %1053 = vperm.xlu0 %1494, %v1045_v59  }
 0x364   : > { %v1048_v11 = vmul.f32 1.442695, %v1047_v60 }
 0x369   : > { %v1081_v20 = vld [vmem:[#allocation2] sm:$0x1] }
 0x3e1   : > { %v1054_v61 = vpop.permute.xlu0 %1053 }
 0x3e2   : > { %v1059_v62 = vrot.slane %v1054_v61, %v2031_v63 }
 0x3e4   : > { %v1060_v3 = vsub.f32 %v1025_v44, %v1059_v62 }
 0x3e6   : > { %v1061_v0 = vmul.f32 1.442695, %v1060_v3 }
 0x3e8   : > { %1572 = vpow2.f32 %v1061_v0 }
 0x3e9   : > { %1574 = vpow2.f32 %v1048_v11 }
 0x3f2   : > { %v1573_v1 = vpop.eup %1572 }
 0x3f3   : > { %v1063_v2 = vsel %vm1033_vm2, %v1573_v1, 0.0  ;;  %v1575_v12 = vpop.eup %1574 }
 0x3f4   : > { %1064 = vadd.xlane.f32.xlu1 %v1063_v2  ;;  %v1050_v14 = vmul.f32 %v1575_v12, %v1046_v13 }
 0x481   : > { %v1065_v4 = vpop.xlane.xlu1 %1064 }
 0x482   : > { %v1066_v5 = vrot.slane %v1065_v4, 4 }
 0x484   : > { %v1067_v6 = vadd.f32 %v1066_v5, %v1065_v4 }
 0x486   : > { %v1068_v7 = vrot.slane %v1067_v6, 2 }
 0x488   : > { %v1069_v8 = vadd.f32 %v1068_v7, %v1067_v6 }
 0x48a   : > { %v1070_v9 = vrot.slane %v1069_v8, 1 }
 0x48c   : > { %v1071_v10 = vadd.f32 %v1070_v9, %v1069_v8 }
 0x48e   : > { %1402 = vpush %v1071_v10 }
 0x4bf   : > { %s1403_s11 = spop %1402 }
 0x4c0   : > { %v1073_v15 = vstv %s1403_s11 }
 0x4c1   : > { %v1074_v16 = vadd.f32 %v1073_v15, %v1050_v14 }
 0x4c3   : > { %1076 = vst.msk [vmem:[#allocation3] sm:$0x1] %vm964_vm3, %v1074_v16 }
 0x4ca   : > { %v1082_v17 = vld [vmem:[#allocation3] sm:$0x1] }
 0x4cb   : > { %1576 = vlog2.f32 %v1082_v17 }
 0x4d5   : > { %v1577_v18 = vpop.eup %1576 }
 0x4d6   : > { %v1084_v19 = vmul.f32 0.6931472, %v1577_v18 }
 0x4d8   : > { %v1085_v21 = vadd.f32 %v1084_v19, %v1081_v20 }
 0x4da   : > { %1089 = vperm.xlu1 %1495, %v1085_v21  }
 0x558   : > { %1102 = sbr.rel (!%p1098_p9) target bundleno = 1375 (0x55f), region = 76 }
 0x559   : > { %v1090_v22 = vpop.permute.xlu1 %1089 }
 0x55a   : > { %v1095_v23 = vrot.slane %v1090_v22, %v2031_v63 }
 0x55c   : > { %v1096_v25 = vsub.f32 %v1086_v24, %v1095_v23 }
 0x55e   : > { %1097 = vst [vmem:[%s1982_s25] sm:$0x1] %v1096_v25 }
 0x55f PF: > { %s1316_s23 = sshll.u32 %s1756_s20, 4  ;;  %s1118_s17 = sshll.u32 %s1982_s25, 4  ;;  %s1119_s17 = int_to_ptr.vmem [resolvable:$true] %s1118_s17 }
 0x560   : > { %s2062_s14 = scalar_lea.hbm %s2137_s9, %s1316_s23  ;;  %s1106_s15 = scalar_lea.sflag [#allocation9], %s394_s30 }
 0x561   : > { %s1646_s18 = scalar_lea.vmem %s1119_s17, 16  ;;  %p2164_p1 = scmp.ne.s32.totalorder %s2155_s28, 0 }
 0x562   : > { %p1647_p13 = scmp.ne.s32.totalorder %s1119_s17, %s1646_s18  ;;  %s1775_s19 = smov [#allocation12]  }
 0x563   : > { %s1650_s12 = sshll.u32 %s1775_s19, 4  ;;  %s1651_s12 = int_to_ptr.vmem [resolvable:$false] %s1650_s12 }
 0x564   : > { %p1648_p2 = pnand %p1647_p13, %p2164_p1  ;;  %s1652_s16 = scalar_lea.vmem %s1651_s12, 32 }
 0x565   : > { %p1653_p10 = scmp.lt.s32.totalorder %s1119_s17, %s1651_s12  ;;  %p1654_p11 = scmp.lt.s32.totalorder %s1652_s16, %s1646_s18 }
 0x566   : > { %p1649_p8 = pneg %p1648_p2 }
 0x567   : > { %p1655_p12 = por %p1654_p11, %p1653_p10 }
 0x569   : > { %p1656_p0 = pnand %p1655_p12, %p1649_p8 }
 0x56b   : > { %1659 = shalt.err (!%p1656_p0)
}
 0x56c   : > { %s1660_s20 = scalar_lea.hbm %s2062_s14, 16  ;;  %s1664_s24 = scalar_lea.hbm %s2137_s9, 128 }
 0x56d   : > { %p1661_p3 = scmp.ne.s32.totalorder %s2062_s14, %s1660_s20  ;;  %p1665_p4 = scmp.lt.u32.totalorder %s2062_s14, %s2137_s9 }
 0x56e   : > { %p1666_p6 = scmp.lt.u32.totalorder %s1664_s24, %s1660_s20  ;;  %p1668_p13 = scmp.lt.u32.totalorder %s1660_s20, %s2062_s14 }
 0x56f   : > { %p1662_p5 = pnand %p1661_p3, %p2164_p1 }
 0x570   : > { %p1667_p9 = por %p1666_p6, %p1665_p4 }
 0x571   : > { %p1663_p7 = pneg %p1662_p5 }
 0x572   : > { %p1669_p2 = por %p1668_p13, %p1667_p9 }
 0x574   : > { %p1670_p8 = pnand %p1669_p2, %p1663_p7 }
 0x576   : > { %1673 = shalt.err (!%p1670_p8)
}
 0x577   : > { %1412 = dma.vmem_to_hbm [thread:$0]  (%p2164_p1), %s1119_s17, 16, %s2062_s14, %s1106_s15  }
 0x578   : > { %s1776_s11 = smov [#allocation13]   ;;  %p2165_p11 = scmp.ne.s32.totalorder %s2153_s27, 0 }
 0x579   : > { %s1129_s23 = sshll.u32 %s1776_s11, 4  ;;  %s1130_s23 = int_to_ptr.vmem [resolvable:$true] %s1129_s23 }
 0x57a   : > { %s1674_s26 = scalar_lea.vmem %s1130_s23, 16  ;;  %s1680_s29 = scalar_lea.vmem %s1130_s23, 32 }
 0x57b   : > { %p1675_p10 = scmp.ne.s32.totalorder %s1130_s23, %s1674_s26  ;;  %p1681_p3 = scmp.lt.s32.totalorder %s1130_s23, %s1130_s23 }
 0x57c   : > { %p1682_p5 = scmp.lt.s32.totalorder %s1680_s29, %s1674_s26 }
 0x57d   : > { %p1676_p12 = pnand %p1675_p10, %p2165_p11 }
 0x57e   : > { %p1683_p4 = por %p1682_p5, %p1681_p3 }
 0x57f   : > { %p1677_p0 = pneg %p1676_p12 }
 0x581   : > { %p1684_p6 = pnand %p1683_p4, %p1677_p0 }
 0x583   : > { %1687 = shalt.err (!%p1684_p6)
}
 0x584   : > { %s1688_s28 = scalar_lea.hbm %s2138_s10, 16 }
 0x585   : > { %p1689_p1 = scmp.ne.s32.totalorder %s2138_s10, %s1688_s28  ;;  %p1694_p13 = scmp.lt.u32.totalorder %s1688_s28, %s2138_s10 }
 0x587   : > { %p1690_p7 = pnand %p1689_p1, %p2165_p11 }
 0x589   : > { %p1691_p9 = pneg %p1690_p7 }
 0x58b   : > { %p1696_p2 = pnand %p1694_p13, %p1691_p9 }
 0x58d   : > { %1699 = shalt.err (!%p1696_p2)
}
 0x58e   : > { %1414 = dma.vmem_to_hbm [thread:$0]  (%p2165_p11), %s1130_s23, 16, %s2138_s10, [#allocation14]  }
 0x58f   : > { %1735 = dma.done.wait (%p2165_p11), [#allocation14], 16  }
 0x590   : > { %1737 = vsyncadd (%p2165_p11), [#allocation14], 4294967280 }
 0x591 PF: > { %s2166_s30 = sld [smem:[#allocation20_spill]]  ;;  %s2167_s25 = sld [smem:[#allocation24_spill]] }
 0x592   : > { %p1435_p8 = scmp.ge.s32.totalorder %s1764_s22, 2 }
 0x597   : > { %s1145_s24 = sand.u32 1, %s2166_s30   ;;  %p2168_p10 = scmp.ne.s32.totalorder %s2167_s25, 0 }
 0x598   : > { %s1146_s21 = scalar_lea.sflag [#allocation9], %s1145_s24 }
 0x599   : > { %p1426_p12 = pnand %p1435_p8, %p2168_p10 }
 0x59b   : > { %1739 = dma.done.wait (!%p1426_p12), %s1146_s21, 16  }
 0x59c   : > { %1741 = vsyncadd (!%p1426_p12), %s1146_s21, 4294967280  ;;  %s33_s22 = sadd.s32 1, %s1764_s22   ;;  %s2169_s13 = sld [smem:[#allocation21_spill]] }
 0x59d   : > { %p30_p0 = scmp.ge.s32.totalorder %s33_s22, 10   ;;  %s2170_s19 = sld [smem:[#allocation25_spill]] }
 0x59e   : > { %s2171_s20 = sld [smem:[#allocation22_spill]]  ;;  %s2172_s21 = sld [smem:[#allocation23_spill]] }
 0x59f   : > { %s2173_s18 = smov %s1748_s0  ;;  %32 = sbr.rel (!%p30_p0) target bundleno = 22 (0x16), region = 127 }
 0x5a2   : > { %s2174_s0 = smov %s2169_s13 }
 0x5a6   :  { %1150 = vsyncpa [#allocation8], 1 }
 0x5a7   :  { %1152 = vsyncpa [#allocation8 + $0x1], 1 }
 0x5a8   :  { %1153 = vsyncpa [#allocation11], 1 }
 0x5a9   :  { %1154 = vsyncpa [#allocation9], 1 }
 0x5aa   :  { %1156 = vsyncpa [#allocation9 + $0x1], 1 }
 0x5ab   :  { %1157 = vsyncpa [#allocation14], 1 }

</bundles_post_ra>
